<compile_context>
chip_gen: v7x
topology: tpu7x:2x2x1
jax: 0.10.0
libtpu: 0.0.40
codegen_flags: <defaults>
</compile_context>

<pallas_src>
import jax
import jax.numpy as jnp
from jax.experimental import pallas as pl
from jax.experimental.pallas import tpu as pltpu

HIDDEN = 128


def _round_up(x, m):
    return ((x + m - 1) // m) * m


def actor_kernel(x_ref, w1_ref, b1_ref, w2_ref, b2_ref, w3_ref, b3_ref, o_ref):
    # Cast the f32 activations to bf16 for the MXU (VPU cast, effectively free).
    x = x_ref[...].astype(jnp.bfloat16)
    # Layer 1: Linear (bf16 MXU inputs, f32 accumulate) + bias + ReLU (f32 VPU).
    h1 = jnp.dot(x, w1_ref[...], preferred_element_type=jnp.float32)
    h1 = jnp.maximum(h1 + b1_ref[...], 0.0)
    # Layer 2: Linear + ReLU.
    h2 = jnp.dot(h1.astype(jnp.bfloat16), w2_ref[...],
                 preferred_element_type=jnp.float32)
    h2 = jnp.maximum(h2 + b2_ref[...], 0.0)
    # Layer 3: Linear -> logits (narrow N = out_size, no padding needed).
    logits = jnp.dot(h2.astype(jnp.bfloat16), w3_ref[...],
                     preferred_element_type=jnp.float32)
    logits = logits + b3_ref[...]
    # Numerically stable softmax along the feature axis; exact divide so every
    # row sums to 1 within f32 rounding (safe for categorical sampling).
    m = jnp.max(logits, axis=-1, keepdims=True)
    e = jnp.exp(logits - m)
    denom = jnp.sum(e, axis=-1, keepdims=True)
    o_ref[...] = e / denom


def prepare_actor_params(params):
    """One-time param prep: cast weights to bf16 (MXU inputs), biases stay f32.

    Weights are stored (in_features, out_features)."""
    return {
        "w1": params["w1"].astype(jnp.bfloat16),
        "b1": params["b1"].reshape(1, -1).astype(jnp.float32),
        "w2": params["w2"].astype(jnp.bfloat16),
        "b2": params["b2"].reshape(1, -1).astype(jnp.float32),
        "w3": params["w3"].astype(jnp.bfloat16),
        "b3": params["b3"].reshape(1, -1).astype(jnp.float32),
    }


def actor_forward(x, prepped):
    """x: (B, in_size) float32. prepped: output of prepare_actor_params."""
    x = x.astype(jnp.float32)
    b, in_size = x.shape
    hidden = prepped["w2"].shape[0]
    out_size = prepped["w3"].shape[1]

    # Batch tile selection:
    #  * B <= 512: one block covering the whole batch (block dims equal the
    #    full array dims -> no (8,128) divisibility constraint, no padding, no
    #    extra HBM copies, single-kernel latency path for B=1).
    #  * large B: tiles that are multiples of 512 (<= 2048) to amortize the
    #    per-grid-step overhead, while keeping >= 2 grid steps so the
    #    "parallel" batch axis can use both v7x TensorCores.
    if b <= 512:
        tb = b
    else:
        tb = min(2048, _round_up(pl.cdiv(b, 2), 512))
    grid = (pl.cdiv(b, tb),)

    return pl.pallas_call(
        actor_kernel,
        out_shape=jax.ShapeDtypeStruct((b, out_size), jnp.float32),
        grid=grid,
        in_specs=[
            pl.BlockSpec((tb, in_size), lambda i: (i, 0)),       # x (pipelined)
            pl.BlockSpec((in_size, hidden), lambda i: (0, 0)),   # w1 (resident)
            pl.BlockSpec((1, hidden), lambda i: (0, 0)),         # b1
            pl.BlockSpec((hidden, hidden), lambda i: (0, 0)),    # w2
            pl.BlockSpec((1, hidden), lambda i: (0, 0)),         # b2
            pl.BlockSpec((hidden, out_size), lambda i: (0, 0)),  # w3
            pl.BlockSpec((1, out_size), lambda i: (0, 0)),       # b3
        ],
        out_specs=pl.BlockSpec((tb, out_size), lambda i: (i, 0)),
        compiler_params=pltpu.CompilerParams(
            dimension_semantics=("parallel",)),
    )(x, prepped["w1"], prepped["b1"], prepped["w2"], prepped["b2"],
      prepped["w3"], prepped["b3"])


def init_actor_params(key, in_size, out_size, hidden=HIDDEN):
    """Deterministic init mimicking PyTorch nn.Linear (uniform +-1/sqrt(fan_in)).
    Weights stored as (in_features, out_features)."""
    ks = jax.random.split(key, 6)

    def lin(kw, kb, fan_in, fan_out):
        bound = 1.0 / jnp.sqrt(jnp.float32(fan_in))
        w = jax.random.uniform(kw, (fan_in, fan_out), jnp.float32, -bound, bound)
        b = jax.random.uniform(kb, (1, fan_out), jnp.float32, -bound, bound)
        return w, b

    w1, b1 = lin(ks[0], ks[1], in_size, hidden)
    w2, b2 = lin(ks[2], ks[3], hidden, hidden)
    w3, b3 = lin(ks[4], ks[5], hidden, out_size)
    return {"w1": w1, "b1": b1, "w2": w2, "b2": b2, "w3": w3, "b3": b3}


def actor_reference(x, params):
    """Mirrors the kernel numerics: bf16 matmul inputs, f32 accumulate/elementwise."""
    w1 = params["w1"].astype(jnp.bfloat16)
    w2 = params["w2"].astype(jnp.bfloat16)
    w3 = params["w3"].astype(jnp.bfloat16)
    h1 = jnp.dot(x.astype(jnp.bfloat16), w1, preferred_element_type=jnp.float32)
    h1 = jnp.maximum(h1 + params["b1"], 0.0)
    h2 = jnp.dot(h1.astype(jnp.bfloat16), w2, preferred_element_type=jnp.float32)
    h2 = jnp.maximum(h2 + params["b2"], 0.0)
    logits = jnp.dot(h2.astype(jnp.bfloat16), w3,
                     preferred_element_type=jnp.float32) + params["b3"]
    return jax.nn.softmax(logits, axis=1)


if __name__ == "__main__":
    in_size, out_size = 32, 8
    key = jax.random.PRNGKey(0)
    k_x, k_b, k_p = jax.random.split(key, 3)

    params = init_actor_params(k_p, in_size, out_size)
    prepped = prepare_actor_params(params)

    # Faithful to the PyTorch forward: a single 1-D observation, unsqueezed to (1, in).
    obs = jax.random.normal(k_x, (in_size,), jnp.float32)
    x1 = obs[None, :]
    out1 = jax.block_until_ready(actor_forward(x1, prepped))
    ref1 = actor_reference(x1, params)
    assert out1.shape == (1, out_size)
    assert jnp.allclose(jnp.sum(out1, axis=1), 1.0, atol=1e-3)
    assert jnp.allclose(out1, ref1, atol=3e-3, rtol=3e-3)

    # Batched path (vectorized envs): exercises the batch grid / ragged batch.
    xb = jax.random.normal(k_b, (5, in_size), jnp.float32)
    outb = jax.block_until_ready(actor_forward(xb, prepped))
    refb = actor_reference(xb, params)
    assert outb.shape == (5, out_size)
    assert jnp.allclose(jnp.sum(outb, axis=1), 1.0, atol=1e-3)
    assert jnp.allclose(outb, refb, atol=3e-3, rtol=3e-3)

    print("KERNEL_OK")
</pallas_src>

<mosaic_0001>
module attributes {stable_mosaic.version = 11 : i64} {
  func.func @actor_kernel(%arg0: i32, %arg1: memref<1x32xf32, #tpu.memory_space<vmem>>, %arg2: memref<32x128xbf16, #tpu.memory_space<vmem>>, %arg3: memref<1x128xf32, #tpu.memory_space<vmem>>, %arg4: memref<128x128xbf16, #tpu.memory_space<vmem>>, %arg5: memref<1x128xf32, #tpu.memory_space<vmem>>, %arg6: memref<128x8xbf16, #tpu.memory_space<vmem>>, %arg7: memref<1x8xf32, #tpu.memory_space<vmem>>, %arg8: memref<1x8xf32, #tpu.memory_space<vmem>>) attributes {dimension_semantics = [#tpu.dimension_semantics<parallel>], iteration_bounds = array<i64: 1>, scalar_prefetch = 0 : i64, scratch_operands = 0 : i64, tpu.core_type = #tpu.core_type<tc>, window_params = [{transform_indices = @transform_0, window_bounds = array<i64: 1, 32>}, {pipeline_mode = #tpu.pipeline_mode<synchronous>, transform_indices = @transform_1, window_bounds = array<i64: 32, 128>}, {pipeline_mode = #tpu.pipeline_mode<synchronous>, transform_indices = @transform_2, window_bounds = array<i64: 1, 128>}, {pipeline_mode = #tpu.pipeline_mode<synchronous>, transform_indices = @transform_3, window_bounds = array<i64: 128, 128>}, {pipeline_mode = #tpu.pipeline_mode<synchronous>, transform_indices = @transform_4, window_bounds = array<i64: 1, 128>}, {pipeline_mode = #tpu.pipeline_mode<synchronous>, transform_indices = @transform_5, window_bounds = array<i64: 128, 8>}, {pipeline_mode = #tpu.pipeline_mode<synchronous>, transform_indices = @transform_6, window_bounds = array<i64: 1, 8>}, {transform_indices = @transform_7, window_bounds = array<i64: 1, 8>}]} {
    %c0 = arith.constant 0 : index
    %c0_0 = arith.constant 0 : index
    %0 = vector.load %arg1[%c0, %c0_0] : memref<1x32xf32, #tpu.memory_space<vmem>>, vector<1x32xf32>
    %1 = arith.truncf %0 : vector<1x32xf32> to vector<1x32xbf16>
    %c0_1 = arith.constant 0 : index
    %c0_2 = arith.constant 0 : index
    %2 = vector.load %arg2[%c0_1, %c0_2] : memref<32x128xbf16, #tpu.memory_space<vmem>>, vector<32x128xbf16>
    %cst = arith.constant dense<0.000000e+00> : vector<1x128xf32>
    %3 = tpu.matmul %1, %2, %cst {dimension_numbers = #tpu.dot_dimension_numbers<[1], [0], [0], [1], [0, 0, 1, 1], [], []>} : vector<1x32xbf16>, vector<32x128xbf16>, vector<1x128xf32> -> vector<1x128xf32>
    %c0_3 = arith.constant 0 : index
    %c0_4 = arith.constant 0 : index
    %4 = vector.load %arg3[%c0_3, %c0_4] : memref<1x128xf32, #tpu.memory_space<vmem>>, vector<1x128xf32>
    %5 = arith.addf %3, %4 : vector<1x128xf32>
    %cst_5 = arith.constant 0.000000e+00 : f32
    %6 = vector.broadcast %cst_5 : f32 to vector<1x128xf32>
    %7 = arith.maximumf %5, %6 : vector<1x128xf32>
    %8 = arith.truncf %7 : vector<1x128xf32> to vector<1x128xbf16>
    %c0_6 = arith.constant 0 : index
    %c0_7 = arith.constant 0 : index
    %9 = vector.load %arg4[%c0_6, %c0_7] : memref<128x128xbf16, #tpu.memory_space<vmem>>, vector<128x128xbf16>
    %cst_8 = arith.constant dense<0.000000e+00> : vector<1x128xf32>
    %10 = tpu.matmul %8, %9, %cst_8 {dimension_numbers = #tpu.dot_dimension_numbers<[1], [0], [0], [1], [0, 0, 1, 1], [], []>} : vector<1x128xbf16>, vector<128x128xbf16>, vector<1x128xf32> -> vector<1x128xf32>
    %c0_9 = arith.constant 0 : index
    %c0_10 = arith.constant 0 : index
    %11 = vector.load %arg5[%c0_9, %c0_10] : memref<1x128xf32, #tpu.memory_space<vmem>>, vector<1x128xf32>
    %12 = arith.addf %10, %11 : vector<1x128xf32>
    %cst_11 = arith.constant 0.000000e+00 : f32
    %13 = vector.broadcast %cst_11 : f32 to vector<1x128xf32>
    %14 = arith.maximumf %12, %13 : vector<1x128xf32>
    %15 = arith.truncf %14 : vector<1x128xf32> to vector<1x128xbf16>
    %c0_12 = arith.constant 0 : index
    %c0_13 = arith.constant 0 : index
    %16 = vector.load %arg6[%c0_12, %c0_13] : memref<128x8xbf16, #tpu.memory_space<vmem>>, vector<128x8xbf16>
    %cst_14 = arith.constant dense<0.000000e+00> : vector<1x8xf32>
    %17 = tpu.matmul %15, %16, %cst_14 {dimension_numbers = #tpu.dot_dimension_numbers<[1], [0], [0], [1], [0, 0, 1, 1], [], []>} : vector<1x128xbf16>, vector<128x8xbf16>, vector<1x8xf32> -> vector<1x8xf32>
    %c0_15 = arith.constant 0 : index
    %c0_16 = arith.constant 0 : index
    %18 = vector.load %arg7[%c0_15, %c0_16] : memref<1x8xf32, #tpu.memory_space<vmem>>, vector<1x8xf32>
    %19 = arith.addf %17, %18 : vector<1x8xf32>
    %cst_17 = arith.constant dense<0xFF800000> : vector<1xf32>
    %20 = vector.multi_reduction <maximumf>, %19, %cst_17 [1] : vector<1x8xf32> to vector<1xf32>
    %21 = vector.shape_cast %20 : vector<1xf32> to vector<1x1xf32>
    %22 = vector.broadcast %21 : vector<1x1xf32> to vector<1x8xf32>
    %23 = arith.subf %19, %22 : vector<1x8xf32>
    %24 = math.exp %23 : vector<1x8xf32>
    %cst_18 = arith.constant dense<0.000000e+00> : vector<1xf32>
    %25 = vector.multi_reduction <add>, %24, %cst_18 [1] : vector<1x8xf32> to vector<1xf32>
    %26 = vector.shape_cast %25 : vector<1xf32> to vector<1x1xf32>
    %27 = vector.broadcast %26 : vector<1x1xf32> to vector<1x8xf32>
    %28 = arith.divf %24, %27 : vector<1x8xf32>
    %c0_19 = arith.constant 0 : index
    %c0_20 = arith.constant 0 : index
    %29 = vector.load %arg8[%c0_19, %c0_20] : memref<1x8xf32, #tpu.memory_space<vmem>>, vector<1x8xf32>
    tpu.vector_store %arg8[%c0_19, %c0_20], %28 {strides = array<i32>} : memref<1x8xf32, #tpu.memory_space<vmem>>, vector<1x8xf32>,
    return
  }
  func.func @transform_0(%arg0: i32) -> (i32, i32) {
    %c0_i32 = arith.constant 0 : i32
    %c0_i32_0 = arith.constant 0 : i32
    return %arg0, %c0_i32 : i32, i32
  }
  func.func @transform_1(%arg0: i32) -> (i32, i32) {
    %c0_i32 = arith.constant 0 : i32
    %c0_i32_0 = arith.constant 0 : i32
    %c0_i32_1 = arith.constant 0 : i32
    return %c0_i32, %c0_i32_0 : i32, i32
  }
  func.func @transform_2(%arg0: i32) -> (i32, i32) {
    %c0_i32 = arith.constant 0 : i32
    %c0_i32_0 = arith.constant 0 : i32
    %c0_i32_1 = arith.constant 0 : i32
    return %c0_i32, %c0_i32_0 : i32, i32
  }
  func.func @transform_3(%arg0: i32) -> (i32, i32) {
    %c0_i32 = arith.constant 0 : i32
    %c0_i32_0 = arith.constant 0 : i32
    %c0_i32_1 = arith.constant 0 : i32
    return %c0_i32, %c0_i32_0 : i32, i32
  }
  func.func @transform_4(%arg0: i32) -> (i32, i32) {
    %c0_i32 = arith.constant 0 : i32
    %c0_i32_0 = arith.constant 0 : i32
    %c0_i32_1 = arith.constant 0 : i32
    return %c0_i32, %c0_i32_0 : i32, i32
  }
  func.func @transform_5(%arg0: i32) -> (i32, i32) {
    %c0_i32 = arith.constant 0 : i32
    %c0_i32_0 = arith.constant 0 : i32
    %c0_i32_1 = arith.constant 0 : i32
    return %c0_i32, %c0_i32_0 : i32, i32
  }
  func.func @transform_6(%arg0: i32) -> (i32, i32) {
    %c0_i32 = arith.constant 0 : i32
    %c0_i32_0 = arith.constant 0 : i32
    %c0_i32_1 = arith.constant 0 : i32
    return %c0_i32, %c0_i32_0 : i32, i32
  }
  func.func @transform_7(%arg0: i32) -> (i32, i32) {
    %c0_i32 = arith.constant 0 : i32
    %c0_i32_0 = arith.constant 0 : i32
    return %arg0, %c0_i32 : i32, i32
  }
}

</mosaic_0001>

<bundles_post_ra>
// kernel: tpu_custom_call.1
= control target key start
LH: loop header
LB: loop body
LE: loop exit
PB: predicated region body
PF: predicated region fallthrough
CT: control target
= control target key end

     0   :  { %12 = vsyncpa [#allocation3], 0  ;;  %s668_s0 = inlined_call_operand.vmem [shape: f32[1,32], index: 0, kind: input, shape index: {}]   ;;  %s669_s1 = inlined_call_operand.hbm [shape: bf16[32,128], index: 1, kind: input, shape index: {}]   ;;  %s670_s2 = inlined_call_operand.vmem [shape: f32[1,128], index: 2, kind: input, shape index: {}]   ;;  %s671_s3 = inlined_call_operand.vmem [shape: bf16[128,128], index: 3, kind: input, shape index: {}]   ;;  %s672_s4 = inlined_call_operand.vmem [shape: f32[1,128], index: 4, kind: input, shape index: {}]   ;;  %s673_s5 = inlined_call_operand.vmem [shape: bf16[128,8], index: 5, kind: input, shape index: {}]   ;;  %s674_s6 = inlined_call_operand.vmem [shape: f32[1,8], index: 6, kind: input, shape index: {}]   ;;  %s675_s7 = inlined_call_operand.hbm [shape: f32[1,8], index: 7, kind: output, shape index: {}]  }
   0x1   :  { %13 = vsyncpa [#allocation4], 0  ;;  %s511_s24 = smov [#allocation2]   ;;  %s463_s28 = scalar_lea.hbm %s669_s1, 256 }
   0x2   :  { %s21_s25 = sshll.u32 %s511_s24, 4  ;;  %p464_p0 = scmp.ne.s32.totalorder %s669_s1, %s463_s28  ;;  %s22_s25 = int_to_ptr.vmem [resolvable:$true] %s21_s25 }
   0x3   :  { %p467_p1 = scmp.lt.u32.totalorder %s463_s28, %s669_s1 }
   0x5   :  { %p469_p2 = pnand %p467_p1, %p464_p0 }
   0x7   :  { %472 = shalt.err (!%p469_p2)
}
   0x8   :  { %s473_s10 = scalar_lea.vmem %s22_s25, 256  ;;  %p478_p4 = scmp.lt.s32.totalorder %s22_s25, %s22_s25 }
   0x9   :  { %p474_p3 = scmp.ne.s32.totalorder %s22_s25, %s473_s10  ;;  %p479_p5 = scmp.lt.s32.totalorder %s473_s10, %s473_s10 }
   0xb   :  { %p480_p6 = por %p479_p5, %p478_p4 }
   0xd   :  { %p481_p7 = pnand %p480_p6, %p474_p3 }
   0xf   :  { %484 = shalt.err (!%p481_p7)
}
  0x10   :  { %s512_s11 = smov 64   ;;  %s513_s12 = smov 4  }
  0x11   :  { %27 = dma.hbm_to_vmem [thread:$0]  %s669_s1, 256, %s22_s25, [#allocation3], %s512_s11, %s512_s11, %s513_s12  }
  0x12   :  { %507 = dma.done.wait [#allocation3], 256  }
  0x13   :  { %508 = vsyncadd [#allocation3], 4294967040  ;;  %v514_v0 = vmov 0.0   ;;  %vm515_vm0 = vmmov 0   ;;  %v441_v1 = vld [vmem:[#allocation2] sm:$0xff]   ;;  %v442_v2 = vld [vmem:[#allocation2 + $0x8] sm:$0xff]  }
  0x14   :  { %387 = vmatprep.subr.bf16.mxu0 %v514_v0  ;;  %391 = vmatprep.mubr.msk.bf16.mxu0 %vm515_vm0, %v514_v0  ;;  %v42_v3 = vld [vmem:[%s668_s0] sm:$0x1]  ;;  %v444_v6 = vld [vmem:[%s671_s3 + $0x8] sm:$0xff]   ;;  %vm61_vm1 = vcmask 261120   ;;  %v445_v7 = vld [vmem:[%s671_s3 + $0x10] sm:$0xff]   ;;  %vm319_vm2 = vcmask 57344  }
  0x15   :  { %395 = vmatprep.subr.bf16.mxu1 %v514_v0  ;;  %411 = vmatprep.mubr.msk.bf16.mxu1 %vm515_vm0, %v514_v0  ;;  %v443_v4 = vld [vmem:[%s671_s3] sm:$0xff]   ;;  %v43_v5 = vpack.c.bf16 %v42_v3, %v42_v3  ;;  %v446_v8 = vld [vmem:[%s671_s3 + $0x18] sm:$0xff]   ;;  %v448_v10 = vld [vmem:[%s671_s3 + $0x28] sm:$0xff]  }
  0x16   :  { %388 = vmatpush3.bf16.msra.mxu0 %v441_v1  ;;  %396 = vmatpush3.bf16.msra.mxu1 %v443_v4  ;;  %v447_v9 = vld [vmem:[%s671_s3 + $0x20] sm:$0xff]   ;;  %v449_v11 = vld [vmem:[%s671_s3 + $0x30] sm:$0xff]   ;;  %v450_v12 = vld [vmem:[%s671_s3 + $0x38] sm:$0xff]  }
  0x17   :  { %389 = vmatprep.subr.bf16.mxu0 %v514_v0  ;;  %397 = vmatprep.subr.bf16.mxu1 %v514_v0  ;;  %v451_v13 = vld [vmem:[%s673_s5] sm:$0xff]   ;;  %v452_v14 = vld [vmem:[%s673_s5 + $0x8] sm:$0xff]   ;;  %v453_v15 = vld [vmem:[%s673_s5 + $0x10] sm:$0xff]  }
  0x18   :  { %v454_v16 = vld [vmem:[%s673_s5 + $0x18] sm:$0xff]   ;;  %v455_v17 = vld [vmem:[%s673_s5 + $0x20] sm:$0xff]   ;;  %v456_v18 = vld [vmem:[%s673_s5 + $0x28] sm:$0xff]  }
  0x19   :  { %v48_v19 = vld [vmem:[%s670_s2] sm:$0x1]  ;;  %v457_v27 = vld [vmem:[%s673_s5 + $0x30] sm:$0xff]   ;;  %v458_v28 = vld [vmem:[%s673_s5 + $0x38] sm:$0xff]  }
  0x1a   :  { %390 = vmatpush3.bf16.msra.mxu0 %v442_v2  ;;  %398 = vmatpush3.bf16.msra.mxu1 %v444_v6  ;;  %v123_v29 = vld [vmem:[%s672_s4] sm:$0x1]  ;;  %s516_s4 = smov [#allocation5]  }
  0x1b   :  { %415 = vmatprep.subr.bf16.mxu0 %v514_v0  ;;  %399 = vmatprep.subr.bf16.mxu1 %v514_v0  ;;  %v230_v37 = vld [vmem:[%s674_s6] sm:$0x1]  ;;  %s338_s5 = sshll.u32 %s516_s4, 4  ;;  %s339_s5 = int_to_ptr.vmem [resolvable:$true] %s338_s5 }
  0x1c   :  { %s485_s6 = scalar_lea.vmem %s339_s5, 16  ;;  %s489_s26 = scalar_lea.vmem %s339_s5, 32 }
  0x1d   :  { %392 = vmatmul.mubr.msk.bf16.vlgmr.msra.gmra.mrb[0].mxu0 %vm61_vm1, %v43_v5  ;;  %p486_p8 = scmp.ne.s32.totalorder %s339_s5, %s485_s6  ;;  %p490_p9 = scmp.lt.s32.totalorder %s339_s5, %s339_s5 }
  0x1e   :  { %431 = vmatprep.mubr.msk.bf16.mxu0 %vm515_vm0, %v514_v0  ;;  %400 = vmatpush3.bf16.msra.mxu1 %v445_v7  ;;  %p491_p10 = scmp.lt.s32.totalorder %s489_s26, %s485_s6 }
  0x1f   :  { %401 = vmatprep.subr.bf16.mxu1 %v514_v0  ;;  %416 = vmatpush3.bf16.msra.mxu0 %v451_v13 }
  0x20   :  { %417 = vmatprep.subr.bf16.mxu0 %v514_v0  ;;  %p492_p11 = por %p491_p10, %p490_p9 }
  0x22   :  { %402 = vmatpush3.bf16.msra.mxu1 %v446_v8  ;;  %p493_p12 = pnand %p492_p11, %p486_p8 }
  0x23   :  { %403 = vmatprep.subr.bf16.mxu1 %v514_v0  ;;  %418 = vmatpush3.bf16.msra.mxu0 %v452_v14 }
  0x24   :  { %419 = vmatprep.subr.bf16.mxu0 %v514_v0 }
  0x26   :  { %404 = vmatpush3.bf16.msra.mxu1 %v447_v9 }
  0x27   :  { %405 = vmatprep.subr.bf16.mxu1 %v514_v0  ;;  %420 = vmatpush3.bf16.msra.mxu0 %v453_v15 }
  0x28   :  { %421 = vmatprep.subr.bf16.mxu0 %v514_v0 }
  0x2a   :  { %406 = vmatpush3.bf16.msra.mxu1 %v448_v10 }
  0x2b   :  { %407 = vmatprep.subr.bf16.mxu1 %v514_v0  ;;  %422 = vmatpush3.bf16.msra.mxu0 %v454_v16 }
  0x2c   :  { %423 = vmatprep.subr.bf16.mxu0 %v514_v0 }
  0x2e   :  { %408 = vmatpush3.bf16.msra.mxu1 %v449_v11 }
  0x2f   :  { %409 = vmatprep.subr.bf16.mxu1 %v514_v0  ;;  %424 = vmatpush3.bf16.msra.mxu0 %v455_v17 }
  0x30   :  { %425 = vmatprep.subr.bf16.mxu0 %v514_v0 }
  0x32   :  { %410 = vmatpush3.bf16.msra.mxu1 %v450_v12 }
  0x33   :  { %426 = vmatpush3.bf16.msra.mxu0 %v456_v18 }
  0x34   :  { %427 = vmatprep.subr.bf16.mxu0 %v514_v0 }
  0x37   :  { %428 = vmatpush3.bf16.msra.mxu0 %v457_v27 }
  0x38   :  { %429 = vmatprep.subr.bf16.mxu0 %v514_v0 }
  0x3b   :  { %430 = vmatpush3.bf16.msra.mxu0 %v458_v28 }
  0xf0   :  { %v99_v20 = vpop.f32.mrb[0].mxu0 }
  0xf1   :  { %v100_v21 = vadd.f32 %v99_v20, %v48_v19  ;;  %v393_v22 = vpop.f32.mrb[1].mxu0 }
  0xf2   :  { %v102_v23 = vpop.f32.mrb[2].mxu0 }
  0xf3   :  { %v105_v24 = vmax.f32 %v100_v21, 0.0  ;;  %v394_v25 = vpop.f32.mrb[3].mxu0 }
  0xf5   :  { %v106_v26 = vpack.c.bf16 %v105_v24, %v105_v24 }
  0xf7   :  { %412 = vmatmul.mubr.bf16.vlgmr.msra.gmra.mrb[0].mxu1 %v106_v26 }
 0x1ca   :  { %v206_v30 = vpop.f32.mrb[0].mxu1 }
 0x1cb   :  { %v207_v31 = vadd.f32 %v206_v30, %v123_v29  ;;  %v413_v32 = vpop.f32.mrb[1].mxu1 }
 0x1cc   :  { %v209_v33 = vpop.f32.mrb[2].mxu1 }
 0x1cd   :  { %v212_v34 = vmax.f32 %v207_v31, 0.0  ;;  %v414_v35 = vpop.f32.mrb[3].mxu1 }
 0x1cf   :  { %v213_v36 = vpack.c.bf16 %v212_v34, %v212_v34 }
 0x1d1   :  { %432 = vmatmul.mubr.bf16.vlgmr.msra.gmra.mrb[4].mxu0 %v213_v36 }
 0x2a4   :  { %v313_v38 = vpop.f32.mrb[4].mxu0 }
 0x2a5   :  { %v314_v39 = vadd.f32 %v313_v38, %v230_v37  ;;  %v433_v40 = vpop.f32.mrb[5].mxu0 }
 0x2a6   :  { %v316_v41 = vpop.f32.mrb[6].mxu0 }
 0x2a7   :  { %v434_v42 = vpop.f32.mrb[7].mxu0  ;;  %v320_v43 = vsel %vm319_vm2, %v314_v39, -inf }
 0x2a8   :  { %321 = vmax.xlane.f32.xlu0 %v320_v43 }
 0x335   :  { %v322_v44 = vpop.xlane.xlu0 %321 }
 0x336   :  { %v323_v45 = vsub.f32 %v314_v39, %v322_v44 }
 0x338   :  { %v324_v46 = vmul.f32 1.442695, %v323_v45 }
 0x33a   :  { %459 = vpow2.f32 %v324_v46 }
 0x344   :  { %v460_v47 = vpop.eup %459 }
 0x345   :  { %v326_v48 = vsel %vm319_vm2, %v460_v47, 0.0 }
 0x346   :  { %327 = vadd.xlane.f32.xlu0 %v326_v48 }
 0x3d3   :  { %v328_v49 = vpop.xlane.xlu0 %327 }
 0x3d4   :  { %461 = vrcp.f32 %v328_v49 }
 0x3de   :  { %v462_v50 = vpop.eup %461 }
 0x3df   :  { %v330_v51 = vmul.f32 %v462_v50, %v460_v47 }
 0x3e1   :  { %331 = vst.msk [vmem:[#allocation5] sm:$0x1] %vm319_vm2, %v330_v51 }
 0x3e2   :  { %496 = shalt.err (!%p493_p12)
}
 0x3e3   :  { %s497_s29 = scalar_lea.hbm %s675_s7, 16 }
 0x3e4   :  { %p498_p13 = scmp.ne.s32.totalorder %s675_s7, %s497_s29  ;;  %p501_p0 = scmp.lt.u32.totalorder %s497_s29, %s675_s7 }
 0x3e6   :  { %p503_p1 = pnand %p501_p0, %p498_p13 }
 0x3e8   :  { %506 = shalt.err (!%p503_p1)
}
 0x3e9   :  { %341 = dma.vmem_to_hbm [thread:$0]  %s339_s5, 16, %s675_s7, [#allocation4]  }
 0x3ea   :  { %509 = dma.done.wait [#allocation4], 16  }
 0x3eb   :  { %510 = vsyncadd [#allocation4], 4294967280 }
 0x3ec   :  { %345 = vsyncpa [#allocation3], 1 }
 0x3ed   :  { %346 = vsyncpa [#allocation4], 1 }

</bundles_post_ra>
